<compile_context>
chip_gen: v7x
topology: tpu7x:2x2x1
jax: 0.10.0
libtpu: 0.0.40
codegen_flags: <defaults>
</compile_context>

<pallas_src>
import functools

import jax
import jax.numpy as jnp
from jax import lax
from jax.experimental import pallas as pl
from jax.experimental.pallas import tpu as pltpu


FEATURE_DIM = 256
OUT_DIM = 2
OUT_ROWS = 8   # sublane-padded row count of the transposed (OUT_ROWS, B) output


def _round_up(a, m):
    return ((a + m - 1) // m) * m


def gate_kernel(x_ref, w1_ref, b1_ref, w2_ref, b2_ref, w3t_ref, b3_ref, o_ref,
                *, chunk, unroll):
    """Fused 3-layer MLP on one (tb, D) batch tile, chunked over rows.

    Output is written transposed: o_ref is (OUT_ROWS, tb); rows 0..1 hold the
    two gate logits for the tile's rows, rows 2..7 are zero padding.
    """
    n_chunks = x_ref.shape[0] // chunk  # static

    def body(c, carry):
        r = pl.multiple_of(c * chunk, chunk)
        x = x_ref[pl.ds(r, chunk), :]                                    # (chunk, D)
        h1 = jnp.dot(x, w1_ref[...],
                     preferred_element_type=jnp.float32) + b1_ref[...]   # f32 (chunk, 256)
        h1 = jnp.maximum(h1, 0.0).astype(w2_ref.dtype)
        h2 = jnp.dot(h1, w2_ref[...],
                     preferred_element_type=jnp.float32) + b2_ref[...]   # f32 (chunk, 256)
        h2 = jnp.maximum(h2, 0.0).astype(w3t_ref.dtype)
        # Layer 3 computed directly transposed:
        #   (OUT_ROWS, 256) . (chunk, 256)^T -> (OUT_ROWS, chunk)
        # A @ B^T is the native MXU (attention-score) pattern, so no explicit
        # XLU transpose and no wasted padded output lanes.
        oT = jnp.einsum("od,kd->ok", w3t_ref[...], h2,
                        preferred_element_type=jnp.float32) + b3_ref[...]
        o_ref[:, pl.ds(r, chunk)] = oT.astype(o_ref.dtype)               # lane-dense store
        return carry

    lax.fori_loop(0, n_chunks, body, 0, unroll=unroll)


def gate_forward(x, w1, b1, w2, b2, w3, b3, *, tb=1024, chunk=256, use_bf16=True):
    """x: (B, head_dim) f32 -> (B, 2) f32 gate logits.

    Weights are stored (in_features, out_features); PyTorch nn.Linear weights
    must be pre-transposed by the caller.  chunk: 256 for v6e/v7x, 128 for v5e.
    """
    B, D = x.shape
    assert w1.shape == (D, FEATURE_DIM)
    assert w2.shape == (FEATURE_DIM, FEATURE_DIM)
    assert w3.shape == (FEATURE_DIM, OUT_DIM)
    assert chunk % 128 == 0, "chunk must be a multiple of 128 lanes"

    # Batch tile: big enough to amortize the per-grid-step overhead, but
    # (a) not bigger than a small B needs and (b) capped so the "parallel"
    # grid keeps >= 2 steps when B is large (keeps both v7x TensorCores busy).
    tb = _round_up(max(tb, chunk), chunk)
    tb = min(tb, _round_up(max(-(-B // 2), chunk), chunk))
    B_pad = _round_up(B, tb)
    if B_pad != B:
        x = jnp.pad(x, ((0, B_pad - B), (0, 0)))

    # bf16 MXU operands with f32 accumulation (bf16-native MXU on v5e/v6e/v7x);
    # biases / ReLU / logits stay f32 on the VPU.
    mm_dtype = jnp.bfloat16 if use_bf16 else jnp.float32
    xk = x.astype(mm_dtype)
    w1k = w1.astype(mm_dtype)
    w2k = w2.astype(mm_dtype)

    # Layer-3 weight stored pre-transposed, padded to 8 sublanes, built
    # directly in the matmul dtype.  Bias as an (8, 1) f32 column.
    w3t = jnp.zeros((OUT_ROWS, FEATURE_DIM), mm_dtype).at[:OUT_DIM, :].set(
        w3.T.astype(mm_dtype))
    b3c = jnp.zeros((OUT_ROWS, 1), jnp.float32).at[:OUT_DIM, 0].set(
        b3.astype(jnp.float32))

    b1r = b1.reshape(1, FEATURE_DIM).astype(jnp.float32)
    b2r = b2.reshape(1, FEATURE_DIM).astype(jnp.float32)

    n_chunks = tb // chunk
    unroll = True if n_chunks <= 4 else 2   # don't let unrolling undo the live-range bound
    kernel = functools.partial(gate_kernel, chunk=chunk, unroll=unroll)

    grid = (B_pad // tb,)
    out_t = pl.pallas_call(
        kernel,
        out_shape=jax.ShapeDtypeStruct((OUT_ROWS, B_pad), jnp.float32),
        grid_spec=pl.GridSpec(
            grid=grid,
            in_specs=[
                pl.BlockSpec((tb, D), lambda i: (i, 0)),                     # x tile
                pl.BlockSpec((D, FEATURE_DIM), lambda i: (0, 0)),            # W1 (resident)
                pl.BlockSpec((1, FEATURE_DIM), lambda i: (0, 0)),            # b1
                pl.BlockSpec((FEATURE_DIM, FEATURE_DIM), lambda i: (0, 0)),  # W2 (resident)
                pl.BlockSpec((1, FEATURE_DIM), lambda i: (0, 0)),            # b2
                pl.BlockSpec((OUT_ROWS, FEATURE_DIM), lambda i: (0, 0)),     # W3^T (resident)
                pl.BlockSpec((OUT_ROWS, 1), lambda i: (0, 0)),               # b3 column
            ],
            out_specs=pl.BlockSpec((OUT_ROWS, tb), lambda i: (0, i)),
        ),
        compiler_params=pltpu.CompilerParams(
            dimension_semantics=("parallel",)),
    )(xk, w1k, b1r, w2k, b2r, w3t, b3c)

    # Compact transposed slab -> (B, 2) logits.
    return out_t[:OUT_DIM, :B].T


def init_gate_params(key, head_dim):
    """Deterministic synthetic init matching nn.Linear shapes (pre-transposed to (in, out))."""
    k1, k2, k3, k4, k5, k6 = jax.random.split(key, 6)

    def unif(k, shape, fan_in):
        bound = 1.0 / jnp.sqrt(fan_in)
        return jax.random.uniform(k, shape, jnp.float32, -bound, bound)

    w1 = unif(k1, (head_dim, FEATURE_DIM), head_dim)
    b1 = unif(k2, (FEATURE_DIM,), head_dim)
    w2 = unif(k3, (FEATURE_DIM, FEATURE_DIM), FEATURE_DIM)
    b2 = unif(k4, (FEATURE_DIM,), FEATURE_DIM)
    w3 = unif(k5, (FEATURE_DIM, OUT_DIM), FEATURE_DIM)
    b3 = unif(k6, (OUT_DIM,), FEATURE_DIM)
    return w1, b1, w2, b2, w3, b3


def gate_ref(x, w1, b1, w2, b2, w3, b3):
    h1 = jnp.maximum(x @ w1 + b1, 0.0)
    h2 = jnp.maximum(h1 @ w2 + b2, 0.0)
    return h2 @ w3 + b3


if __name__ == "__main__":
    key = jax.random.PRNGKey(0)
    kx, kx2, kp = jax.random.split(key, 3)

    B, HEAD_DIM = 16, 32
    x = jax.random.normal(kx, (B, HEAD_DIM), jnp.float32)
    params = init_gate_params(kp, HEAD_DIM)
    ref = gate_ref(x, *params)

    # Default path: bf16 MXU operands, f32 accumulate (looser tolerance).
    out_bf16 = jax.block_until_ready(gate_forward(x, *params))
    assert out_bf16.shape == (B, OUT_DIM)
    assert jnp.allclose(out_bf16, ref, atol=5e-2, rtol=5e-2), "bf16 path mismatch vs reference"

    # f32-operand path (MXU default f32 precision; slightly loosened tolerance).
    out_f32 = jax.block_until_ready(gate_forward(x, *params, use_bf16=False))
    assert out_f32.shape == (B, OUT_DIM)
    assert jnp.allclose(out_f32, ref, atol=1e-4, rtol=1e-4), "f32 path mismatch vs reference"

    # Ragged batch exercising a multi-step grid (tb auto-selected, padded rows).
    B2 = 300
    x2 = jax.random.normal(kx2, (B2, HEAD_DIM), jnp.float32)
    ref2 = gate_ref(x2, *params)
    out2 = jax.block_until_ready(gate_forward(x2, *params))
    assert out2.shape == (B2, OUT_DIM)
    assert jnp.allclose(out2, ref2, atol=5e-2, rtol=5e-2), "multi-step grid mismatch vs reference"

    print("KERNEL_OK")
</pallas_src>

<mosaic_0001>
module attributes {stable_mosaic.version = 11 : i64} {
  func.func @gate_kernel(%arg0: i32, %arg1: memref<256x32xbf16, #tpu.memory_space<vmem>>, %arg2: memref<32x256xbf16, #tpu.memory_space<vmem>>, %arg3: memref<1x256xf32, #tpu.memory_space<vmem>>, %arg4: memref<256x256xbf16, #tpu.memory_space<vmem>>, %arg5: memref<1x256xf32, #tpu.memory_space<vmem>>, %arg6: memref<8x256xbf16, #tpu.memory_space<vmem>>, %arg7: memref<8x1xf32, #tpu.memory_space<vmem>>, %arg8: memref<8x256xf32, #tpu.memory_space<vmem>>) attributes {dimension_semantics = [#tpu.dimension_semantics<parallel>], iteration_bounds = array<i64: 1>, scalar_prefetch = 0 : i64, scratch_operands = 0 : i64, tpu.core_type = #tpu.core_type<tc>, window_params = [{transform_indices = @transform_0, window_bounds = array<i64: 256, 32>}, {pipeline_mode = #tpu.pipeline_mode<synchronous>, transform_indices = @transform_1, window_bounds = array<i64: 32, 256>}, {pipeline_mode = #tpu.pipeline_mode<synchronous>, transform_indices = @transform_2, window_bounds = array<i64: 1, 256>}, {pipeline_mode = #tpu.pipeline_mode<synchronous>, transform_indices = @transform_3, window_bounds = array<i64: 256, 256>}, {pipeline_mode = #tpu.pipeline_mode<synchronous>, transform_indices = @transform_4, window_bounds = array<i64: 1, 256>}, {pipeline_mode = #tpu.pipeline_mode<synchronous>, transform_indices = @transform_5, window_bounds = array<i64: 8, 256>}, {pipeline_mode = #tpu.pipeline_mode<synchronous>, transform_indices = @transform_6, window_bounds = array<i64: 8, 1>}, {transform_indices = @transform_7, window_bounds = array<i64: 8, 256>}]} {
    %c0_i32 = arith.constant 0 : i32
    %c256_i32 = arith.constant 256 : i32
    %0 = arith.muli %c0_i32, %c256_i32 : i32
    %1 = tpu.assume_multiple %0, 256 : i32
    %2 = arith.index_cast %1 : i32 to index
    %c0 = arith.constant 0 : index
    %3 = vector.load %arg1[%2, %c0] : memref<256x32xbf16, #tpu.memory_space<vmem>>, vector<256x32xbf16>
    %c0_0 = arith.constant 0 : index
    %c0_1 = arith.constant 0 : index
    %4 = vector.load %arg2[%c0_0, %c0_1] : memref<32x256xbf16, #tpu.memory_space<vmem>>, vector<32x256xbf16>
    %cst = arith.constant dense<0.000000e+00> : vector<256x256xf32>
    %5 = tpu.matmul %3, %4, %cst {dimension_numbers = #tpu.dot_dimension_numbers<[1], [0], [0], [1], [0, 0, 1, 1], [], []>} : vector<256x32xbf16>, vector<32x256xbf16>, vector<256x256xf32> -> vector<256x256xf32>
    %c0_2 = arith.constant 0 : index
    %c0_3 = arith.constant 0 : index
    %6 = vector.load %arg3[%c0_2, %c0_3] : memref<1x256xf32, #tpu.memory_space<vmem>>, vector<1x256xf32>
    %7 = vector.broadcast %6 : vector<1x256xf32> to vector<256x256xf32>
    %8 = arith.addf %5, %7 : vector<256x256xf32>
    %cst_4 = arith.constant 0.000000e+00 : f32
    %9 = vector.broadcast %cst_4 : f32 to vector<256x256xf32>
    %10 = arith.maximumf %8, %9 : vector<256x256xf32>
    %11 = arith.truncf %10 : vector<256x256xf32> to vector<256x256xbf16>
    %c0_5 = arith.constant 0 : index
    %c0_6 = arith.constant 0 : index
    %12 = vector.load %arg4[%c0_5, %c0_6] : memref<256x256xbf16, #tpu.memory_space<vmem>>, vector<256x256xbf16>
    %cst_7 = arith.constant dense<0.000000e+00> : vector<256x256xf32>
    %13 = tpu.matmul %11, %12, %cst_7 {dimension_numbers = #tpu.dot_dimension_numbers<[1], [0], [0], [1], [0, 0, 1, 1], [], []>} : vector<256x256xbf16>, vector<256x256xbf16>, vector<256x256xf32> -> vector<256x256xf32>
    %c0_8 = arith.constant 0 : index
    %c0_9 = arith.constant 0 : index
    %14 = vector.load %arg5[%c0_8, %c0_9] : memref<1x256xf32, #tpu.memory_space<vmem>>, vector<1x256xf32>
    %15 = vector.broadcast %14 : vector<1x256xf32> to vector<256x256xf32>
    %16 = arith.addf %13, %15 : vector<256x256xf32>
    %cst_10 = arith.constant 0.000000e+00 : f32
    %17 = vector.broadcast %cst_10 : f32 to vector<256x256xf32>
    %18 = arith.maximumf %16, %17 : vector<256x256xf32>
    %19 = arith.truncf %18 : vector<256x256xf32> to vector<256x256xbf16>
    %c0_11 = arith.constant 0 : index
    %c0_12 = arith.constant 0 : index
    %20 = vector.load %arg6[%c0_11, %c0_12] : memref<8x256xbf16, #tpu.memory_space<vmem>>, vector<8x256xbf16>
    "tpu.trace_start"() <{level = 10 : i32, message = "od,kd->ok"}> : () -> ()
    %cst_13 = arith.constant dense<0.000000e+00> : vector<8x256xf32>
    %21 = tpu.matmul %20, %19, %cst_13 {dimension_numbers = #tpu.dot_dimension_numbers<[1], [1], [0], [0], [0, 0, 1, 0], [], []>} : vector<8x256xbf16>, vector<256x256xbf16>, vector<8x256xf32> -> vector<8x256xf32>
    "tpu.trace_stop"() : () -> ()
    %c0_14 = arith.constant 0 : index
    %c0_15 = arith.constant 0 : index
    %22 = vector.load %arg7[%c0_14, %c0_15] : memref<8x1xf32, #tpu.memory_space<vmem>>, vector<8x1xf32>
    %23 = vector.broadcast %22 : vector<8x1xf32> to vector<8x256xf32>
    %24 = arith.addf %21, %23 : vector<8x256xf32>
    %c0_16 = arith.constant 0 : index
    %25 = arith.index_cast %1 : i32 to index
    %26 = vector.load %arg8[%c0_16, %25] : memref<8x256xf32, #tpu.memory_space<vmem>>, vector<8x256xf32>
    tpu.vector_store %arg8[%c0_16, %25], %24 {strides = array<i32>} : memref<8x256xf32, #tpu.memory_space<vmem>>, vector<8x256xf32>,
    %c1_i32 = arith.constant 1 : i32
    return
  }
  func.func @transform_0(%arg0: i32) -> (i32, i32) {
    %c0_i32 = arith.constant 0 : i32
    %c0_i32_0 = arith.constant 0 : i32
    return %arg0, %c0_i32 : i32, i32
  }
  func.func @transform_1(%arg0: i32) -> (i32, i32) {
    %c0_i32 = arith.constant 0 : i32
    %c0_i32_0 = arith.constant 0 : i32
    %c0_i32_1 = arith.constant 0 : i32
    return %c0_i32, %c0_i32_0 : i32, i32
  }
  func.func @transform_2(%arg0: i32) -> (i32, i32) {
    %c0_i32 = arith.constant 0 : i32
    %c0_i32_0 = arith.constant 0 : i32
    %c0_i32_1 = arith.constant 0 : i32
    return %c0_i32, %c0_i32_0 : i32, i32
  }
  func.func @transform_3(%arg0: i32) -> (i32, i32) {
    %c0_i32 = arith.constant 0 : i32
    %c0_i32_0 = arith.constant 0 : i32
    %c0_i32_1 = arith.constant 0 : i32
    return %c0_i32, %c0_i32_0 : i32, i32
  }
  func.func @transform_4(%arg0: i32) -> (i32, i32) {
    %c0_i32 = arith.constant 0 : i32
    %c0_i32_0 = arith.constant 0 : i32
    %c0_i32_1 = arith.constant 0 : i32
    return %c0_i32, %c0_i32_0 : i32, i32
  }
  func.func @transform_5(%arg0: i32) -> (i32, i32) {
    %c0_i32 = arith.constant 0 : i32
    %c0_i32_0 = arith.constant 0 : i32
    %c0_i32_1 = arith.constant 0 : i32
    return %c0_i32, %c0_i32_0 : i32, i32
  }
  func.func @transform_6(%arg0: i32) -> (i32, i32) {
    %c0_i32 = arith.constant 0 : i32
    %c0_i32_0 = arith.constant 0 : i32
    %c0_i32_1 = arith.constant 0 : i32
    return %c0_i32, %c0_i32_0 : i32, i32
  }
  func.func @transform_7(%arg0: i32) -> (i32, i32) {
    %c0_i32 = arith.constant 0 : i32
    %c0_i32_0 = arith.constant 0 : i32
    return %c0_i32, %arg0 : i32, i32
  }
}

</mosaic_0001>

<bundles_post_ra>
// kernel: tpu_custom_call.1
= control target key start
LH: loop header
LB: loop body
LE: loop exit
PB: predicated region body
PF: predicated region fallthrough
CT: control target
= control target key end

     0   :  { %12 = vsyncpa [#allocation3], 0  ;;  %s1617_s0 = inlined_call_operand.vmem [shape: bf16[256,32], index: 0, kind: input, shape index: {}]   ;;  %s1618_s1 = inlined_call_operand.vmem [shape: bf16[32,256], index: 1, kind: input, shape index: {}]   ;;  %s1619_s2 = inlined_call_operand.vmem [shape: f32[1,256], index: 2, kind: input, shape index: {}]   ;;  %s1620_s3 = inlined_call_operand.hbm [shape: bf16[256,256], index: 3, kind: input, shape index: {}]   ;;  %s1621_s4 = inlined_call_operand.vmem [shape: f32[1,256], index: 4, kind: input, shape index: {}]   ;;  %s1622_s5 = inlined_call_operand.vmem [shape: bf16[8,256], index: 5, kind: input, shape index: {}]   ;;  %s1623_s6 = inlined_call_operand.vmem [shape: f32[8,1], index: 6, kind: input, shape index: {}]   ;;  %s1624_s7 = inlined_call_operand.hbm [shape: f32[8,256], index: 7, kind: output, shape index: {}]  }
   0x1   :  { %13 = vsyncpa [#allocation4], 0  ;;  %s1289_s24 = smov [#allocation2]   ;;  %s1241_s28 = scalar_lea.hbm %s1620_s3, 4096 }
   0x2   :  { %s25_s25 = sshll.u32 %s1289_s24, 4  ;;  %p1242_p0 = scmp.ne.s32.totalorder %s1620_s3, %s1241_s28  ;;  %s26_s25 = int_to_ptr.vmem [resolvable:$true] %s25_s25 }
   0x3   :  { %p1245_p1 = scmp.lt.u32.totalorder %s1241_s28, %s1620_s3 }
   0x5   :  { %p1247_p2 = pnand %p1245_p1, %p1242_p0 }
   0x7   :  { %1250 = shalt.err (!%p1247_p2)
}
   0x8   :  { %s1251_s10 = scalar_lea.vmem %s26_s25, 4096  ;;  %p1256_p4 = scmp.lt.s32.totalorder %s26_s25, %s26_s25 }
   0x9   :  { %p1252_p3 = scmp.ne.s32.totalorder %s26_s25, %s1251_s10  ;;  %p1257_p5 = scmp.lt.s32.totalorder %s1251_s10, %s1251_s10 }
   0xb   :  { %p1258_p6 = por %p1257_p5, %p1256_p4 }
   0xd   :  { %p1259_p7 = pnand %p1258_p6, %p1252_p3 }
   0xf   :  { %1262 = shalt.err (!%p1259_p7)
}
  0x10   :  { %s1290_s11 = smov 128   ;;  %s1291_s12 = smov 8  }
  0x11   :  { %31 = dma.hbm_to_vmem [thread:$0]  %s1620_s3, 4096, %s26_s25, [#allocation3], %s1290_s11, %s1290_s11, %s1291_s12  }
  0x12   :  { %1285 = dma.done.wait [#allocation3], 4096  }
  0x13   :  { %1286 = vsyncadd [#allocation3], 4294963200  ;;  %v1292_v0 = vmov 0   ;;  %v1169_v1 = vld [vmem:[%s1618_s1 + $0x4] ss:$8 sps:$4 sm:$0xff]   ;;  %vm190_vm0 = vcmask 261120   ;;  %v80_v53 = vlaneseq }
  0x14   :  { %271 = vmatprep.mubr.bf16.mxu0 %v1292_v0  ;;  %1168 = vset.pattern.permute.xlu0 %v1292_v0  ;;  %v1171_v2 = vld [vmem:[%s1618_s1] ss:$8 sps:$4 sm:$0xff]   ;;  %v1172_v3 = vld [vmem:[%s1618_s1 + $0x14] ss:$8 sps:$4 sm:$0xff]   ;;  %v1174_v4 = vld [vmem:[%s1618_s1 + $0x10] ss:$8 sps:$4 sm:$0xff]  }
  0x15   :  { %239 = vmatprep.subr.bf16.mxu0 %v1169_v1  ;;  %v1175_v5 = vld [vmem:[%s1617_s0] sm:$0xff]   ;;  %v1176_v6 = vld [vmem:[%s1617_s0 + $0x8] sm:$0xff]   ;;  %v1194_v9 = vld [vmem:[#allocation2 + $0x14] ss:$8 sps:$4 sm:$0xff]   ;;  %v1439_v54 = vshrl.u32 %v80_v53, 7 }
  0x16   :  { %240 = vmatpush1.bf16.msra.mxu0 %v1171_v2  ;;  %v1191_v7 = vld [vmem:[#allocation2 + $0x4] ss:$8 sps:$4 sm:$0xff]   ;;  %v1193_v8 = vld [vmem:[#allocation2] ss:$8 sps:$4 sm:$0xff]   ;;  %v1177_v10 = vld [vmem:[%s1617_s0 + $0x10] sm:$0xff]  }
  0x17   :  { %241 = vmatprep.subr.bf16.mxu0 %v1172_v3  ;;  %732 = vmatprep.subr.bf16.mxu1 %v1191_v7  ;;  %v1196_v11 = vld [vmem:[#allocation2 + $0x10] ss:$8 sps:$4 sm:$0xff]   ;;  %v1197_v12 = vld [vmem:[#allocation2 + $0x24] ss:$8 sps:$4 sm:$0xff]   ;;  %v1199_v13 = vld [vmem:[#allocation2 + $0x20] ss:$8 sps:$4 sm:$0xff]  }
  0x18   :  { %733 = vmatpush1.bf16.msra.mxu1 %v1193_v8  ;;  %v1200_v14 = vld [vmem:[#allocation2 + $0x34] ss:$8 sps:$4 sm:$0xff]   ;;  %v1202_v16 = vld [vmem:[#allocation2 + $0x30] ss:$8 sps:$4 sm:$0xff]   ;;  %v1203_v17 = vld [vmem:[#allocation2 + $0x44] ss:$8 sps:$4 sm:$0xff]  }
  0x19   :  { %734 = vmatprep.subr.bf16.mxu1 %v1194_v9  ;;  %v1178_v15 = vld [vmem:[%s1617_s0 + $0x18] sm:$0xff]   ;;  %v1205_v18 = vld [vmem:[#allocation2 + $0x40] ss:$8 sps:$4 sm:$0xff]   ;;  %v1209_v22 = vld [vmem:[#allocation2 + $0x64] ss:$8 sps:$4 sm:$0xff]   ;;  %v82_v55 = vsub.s32 0, %v1439_v54 }
  0x1a   :  { %242 = vmatpush1.bf16.msra.mxu0 %v1174_v4  ;;  %v1206_v19 = vld [vmem:[#allocation2 + $0x54] ss:$8 sps:$4 sm:$0xff]   ;;  %v1179_v20 = vld [vmem:[%s1617_s0 + $0x20] sm:$0xff]   ;;  %v1208_v21 = vld [vmem:[#allocation2 + $0x50] ss:$8 sps:$4 sm:$0xff]   ;;  %v86_v57 = vsub.s32 1, %v1439_v54 }
  0x1b   :  { %v1211_v23 = vld [vmem:[#allocation2 + $0x60] ss:$8 sps:$4 sm:$0xff]   ;;  %v1212_v24 = vld [vmem:[#allocation2 + $0x74] ss:$8 sps:$4 sm:$0xff]   ;;  %v1214_v26 = vld [vmem:[#allocation2 + $0x70] ss:$8 sps:$4 sm:$0xff]  }
  0x1c   :  { %735 = vmatpush1.bf16.msra.mxu1 %v1196_v11  ;;  %v1180_v25 = vld [vmem:[%s1617_s0 + $0x28] sm:$0xff]   ;;  %v1218_v29 = vld [vmem:[#allocation2 + $0x94] ss:$8 sps:$4 sm:$0xff]   ;;  %v1220_v31 = vld [vmem:[#allocation2 + $0x90] ss:$8 sps:$4 sm:$0xff]  }
  0x1d   :  { %1113 = vmatmul.mubr.msk.bf16.vlgmr.msra.gmra.mrb[0].mxu0 %vm190_vm0, %v1175_v5  ;;  %736 = vmatprep.subr.bf16.mxu1 %v1197_v12  ;;  %v1215_v27 = vld [vmem:[#allocation2 + $0x84] ss:$8 sps:$4 sm:$0xff]   ;;  %v1217_v28 = vld [vmem:[#allocation2 + $0x80] ss:$8 sps:$4 sm:$0xff]   ;;  %v1181_v30 = vld [vmem:[%s1617_s0 + $0x30] sm:$0xff]  }
  0x1e   :  { %281 = vmatprep.mubr.bf16.mxu0 %v1292_v0  ;;  %v1221_v32 = vld [vmem:[#allocation2 + $0xa4] ss:$8 sps:$4 sm:$0xff]   ;;  %v1223_v33 = vld [vmem:[#allocation2 + $0xa0] ss:$8 sps:$4 sm:$0xff]   ;;  %v1224_v34 = vld [vmem:[#allocation2 + $0xb4] ss:$8 sps:$4 sm:$0xff]  }
  0x1f   :  { %v1182_v35 = vld [vmem:[%s1617_s0 + $0x38] sm:$0xff]   ;;  %v1227_v37 = vld [vmem:[#allocation2 + $0xc4] ss:$8 sps:$4 sm:$0xff]   ;;  %v1229_v38 = vld [vmem:[#allocation2 + $0xc0] ss:$8 sps:$4 sm:$0xff]  }
  0x20   :  { %737 = vmatpush1.bf16.msra.mxu1 %v1199_v13  ;;  %v1226_v36 = vld [vmem:[#allocation2 + $0xb0] ss:$8 sps:$4 sm:$0xff]   ;;  %v1230_v39 = vld [vmem:[#allocation2 + $0xd4] ss:$8 sps:$4 sm:$0xff]   ;;  %v1183_v40 = vld [vmem:[%s1617_s0 + $0x40] sm:$0xff]  }
  0x21   :  { %738 = vmatprep.subr.bf16.mxu1 %v1200_v14  ;;  %v1184_v41 = vld [vmem:[%s1617_s0 + $0x48] sm:$0xff]   ;;  %v1185_v42 = vld [vmem:[%s1617_s0 + $0x50] sm:$0xff]   ;;  %v1186_v44 = vld [vmem:[%s1617_s0 + $0x58] sm:$0xff]  }
  0x22   :  { %v1232_v43 = vld [vmem:[#allocation2 + $0xd0] ss:$8 sps:$4 sm:$0xff]   ;;  %v1233_v45 = vld [vmem:[#allocation2 + $0xe4] ss:$8 sps:$4 sm:$0xff]   ;;  %v1235_v46 = vld [vmem:[#allocation2 + $0xe0] ss:$8 sps:$4 sm:$0xff]  }
  0x23   :  { %v1236_v47 = vld [vmem:[#allocation2 + $0xf4] ss:$8 sps:$4 sm:$0xff]   ;;  %v1238_v48 = vld [vmem:[#allocation2 + $0xf0] ss:$8 sps:$4 sm:$0xff]   ;;  %v1187_v49 = vld [vmem:[%s1617_s0 + $0x60] sm:$0xff]  }
  0x24   :  { %739 = vmatpush1.bf16.msra.mxu1 %v1202_v16  ;;  %v1188_v50 = vld [vmem:[%s1617_s0 + $0x68] sm:$0xff]   ;;  %v1189_v51 = vld [vmem:[%s1617_s0 + $0x70] sm:$0xff]   ;;  %v1190_v52 = vld [vmem:[%s1617_s0 + $0x78] sm:$0xff]  }
  0x25   :  { %1114 = vmatmul.mubr.msk.bf16.gmra.mrb[4].mxu0 %vm190_vm0, %v1176_v6  ;;  %740 = vmatprep.subr.bf16.mxu1 %v1203_v17  ;;  %v78_v56 = vld [vmem:[%s1619_s2] sm:$0x3] }
  0x26   :  { %291 = vmatprep.mubr.bf16.mxu0 %v1292_v0  ;;  %v1448_v58 = vrot.slane %v78_v56, %v82_v55  ;;  %v1452_v59 = vrot.slane %v78_v56, %v86_v57 }
  0x28   :  { %741 = vmatpush1.bf16.msra.mxu1 %v1205_v18 }
  0x29   :  { %742 = vmatprep.subr.bf16.mxu1 %v1206_v19 }
  0x2c   :  { %743 = vmatpush1.bf16.msra.mxu1 %v1208_v21 }
  0x2d   :  { %1115 = vmatmul.mubr.msk.bf16.gmra.mrb[8].mxu0 %vm190_vm0, %v1177_v10  ;;  %744 = vmatprep.subr.bf16.mxu1 %v1209_v22 }
  0x2e   :  { %301 = vmatprep.mubr.bf16.mxu0 %v1292_v0 }
  0x30   :  { %745 = vmatpush1.bf16.msra.mxu1 %v1211_v23 }
  0x31   :  { %746 = vmatprep.subr.bf16.mxu1 %v1212_v24 }
  0x34   :  { %747 = vmatpush1.bf16.msra.mxu1 %v1214_v26 }
  0x35   :  { %1116 = vmatmul.mubr.msk.bf16.gmra.mrb[12].mxu0 %vm190_vm0, %v1178_v15  ;;  %748 = vmatprep.subr.bf16.mxu1 %v1215_v27 }
  0x36   :  { %311 = vmatprep.mubr.bf16.mxu0 %v1292_v0 }
  0x38   :  { %749 = vmatpush1.bf16.msra.mxu1 %v1217_v28 }
  0x39   :  { %750 = vmatprep.subr.bf16.mxu1 %v1218_v29 }
  0x3c   :  { %751 = vmatpush1.bf16.msra.mxu1 %v1220_v31 }
  0x3d   :  { %1117 = vmatmul.mubr.msk.bf16.gmra.mrb[16].mxu0 %vm190_vm0, %v1179_v20  ;;  %752 = vmatprep.subr.bf16.mxu1 %v1221_v32 }
  0x3e   :  { %321 = vmatprep.mubr.bf16.mxu0 %v1292_v0 }
  0x40   :  { %753 = vmatpush1.bf16.msra.mxu1 %v1223_v33 }
  0x41   :  { %754 = vmatprep.subr.bf16.mxu1 %v1224_v34 }
  0x44   :  { %755 = vmatpush1.bf16.msra.mxu1 %v1226_v36 }
  0x45   :  { %1118 = vmatmul.mubr.msk.bf16.gmra.mrb[20].mxu0 %vm190_vm0, %v1180_v25  ;;  %756 = vmatprep.subr.bf16.mxu1 %v1227_v37 }
  0x46   :  { %331 = vmatprep.mubr.bf16.mxu0 %v1292_v0 }
  0x48   :  { %757 = vmatpush1.bf16.msra.mxu1 %v1229_v38 }
  0x49   :  { %758 = vmatprep.subr.bf16.mxu1 %v1230_v39 }
  0x4c   :  { %759 = vmatpush1.bf16.msra.mxu1 %v1232_v43 }
  0x4d   :  { %1119 = vmatmul.mubr.msk.bf16.gmra.mrb[24].mxu0 %vm190_vm0, %v1181_v30  ;;  %760 = vmatprep.subr.bf16.mxu1 %v1233_v45 }
  0x4e   :  { %341 = vmatprep.mubr.bf16.mxu0 %v1292_v0 }
  0x50   :  { %761 = vmatpush1.bf16.msra.mxu1 %v1235_v46 }
  0x51   :  { %762 = vmatprep.subr.bf16.mxu1 %v1236_v47 }
  0x54   :  { %763 = vmatpush1.bf16.msra.mxu1 %v1238_v48 }
  0x55   :  { %1120 = vmatmul.mubr.msk.bf16.gmra.mrb[28].mxu0 %vm190_vm0, %v1182_v35 }
  0x56   :  { %351 = vmatprep.mubr.bf16.mxu0 %v1292_v0 }
  0x5d   :  { %1121 = vmatmul.mubr.msk.bf16.gmra.mrb[32].mxu0 %vm190_vm0, %v1183_v40 }
  0x5e   :  { %361 = vmatprep.mubr.bf16.mxu0 %v1292_v0 }
  0x65   :  { %1122 = vmatmul.mubr.msk.bf16.gmra.mrb[36].mxu0 %vm190_vm0, %v1184_v41 }
  0x66   :  { %371 = vmatprep.mubr.bf16.mxu0 %v1292_v0 }
  0x6d   :  { %1123 = vmatmul.mubr.msk.bf16.gmra.mrb[40].mxu0 %vm190_vm0, %v1185_v42 }
  0x6e   :  { %381 = vmatprep.mubr.bf16.mxu0 %v1292_v0 }
  0x75   :  { %1124 = vmatmul.mubr.msk.bf16.gmra.mrb[44].mxu0 %vm190_vm0, %v1186_v44 }
  0x76   :  { %391 = vmatprep.mubr.bf16.mxu0 %v1292_v0 }
  0x7d   :  { %1125 = vmatmul.mubr.msk.bf16.gmra.mrb[48].mxu0 %vm190_vm0, %v1187_v49 }
  0x7e   :  { %401 = vmatprep.mubr.bf16.mxu0 %v1292_v0 }
  0x85   :  { %1126 = vmatmul.mubr.msk.bf16.gmra.mrb[52].mxu0 %vm190_vm0, %v1188_v50 }
  0x86   :  { %411 = vmatprep.mubr.bf16.mxu0 %v1292_v0 }
  0x8d   :  { %1127 = vmatmul.mubr.msk.bf16.gmra.mrb[56].mxu0 %vm190_vm0, %v1189_v51 }
  0x8e   :  { %421 = vmatprep.mubr.bf16.mxu0 %v1292_v0 }
  0x95   :  { %1128 = vmatmul.mubr.msk.bf16.gmra.mrb[60].mxu0 %vm190_vm0, %v1190_v52 }
  0xf0   :  { %v273_v60 = vpop.f32.mrb[0].mxu0 }
  0xf1   :  { %v274_v61 = vadd.f32 %v273_v60, %v1448_v58  ;;  %v275_v62 = vpop.f32.mrb[1].mxu0 }
  0xf2   :  { %v276_v63 = vadd.f32 %v275_v62, %v1452_v59  ;;  %v277_v0 = vpop.f32.mrb[2].mxu0 }
  0xf3   :  { %v278_v1 = vadd.f32 %v277_v0, %v1448_v58  ;;  %v279_v2 = vpop.f32.mrb[3].mxu0  ;;  %v432_v4 = vmax.f32 %v274_v61, 0.0 }
  0xf4   :  { %v280_v3 = vadd.f32 %v279_v2, %v1452_v59  ;;  %v433_v6 = vmax.f32 %v276_v63, 0.0 }
  0xf5   :  { %v434_v5 = vmax.f32 %v278_v1, 0.0 }
  0xf6   :  { %v435_v7 = vmax.f32 %v280_v3, 0.0 }
  0xf7   :  { %v496_v8 = vpack.c.bf16 %v434_v5, %v432_v4 }
  0xf8   :  { %v283_v9 = vpop.f32.mrb[4].mxu0  ;;  %v497_v10 = vpack.c.bf16 %v435_v7, %v433_v6 }
  0xf9   :  { %v284_v11 = vadd.f32 %v283_v9, %v1448_v58  ;;  %v285_v12 = vpop.f32.mrb[5].mxu0 }
  0xfa   :  { %v286_v13 = vadd.f32 %v285_v12, %v1452_v59  ;;  %v287_v14 = vpop.f32.mrb[6].mxu0  ;;  %764 = vmatprep.mubr.bf16.mxu1 %v497_v10 }
  0xfb   :  { %v288_v15 = vadd.f32 %v287_v14, %v1448_v58  ;;  %v289_v16 = vpop.f32.mrb[7].mxu0  ;;  %765 = vmatmul.mubr.bf16.vlgmr.msra.gmra.mrb[0].mxu1 %v496_v8  ;;  %v436_v18 = vmax.f32 %v284_v11, 0.0 }
  0xfc   :  { %v290_v17 = vadd.f32 %v289_v16, %v1452_v59  ;;  %v437_v20 = vmax.f32 %v286_v13, 0.0 }
  0xfd   :  { %v438_v19 = vmax.f32 %v288_v15, 0.0 }
  0xfe   :  { %v439_v21 = vmax.f32 %v290_v17, 0.0 }
  0xff   :  { %v498_v22 = vpack.c.bf16 %v438_v19, %v436_v18 }
 0x100   :  { %v499_v23 = vpack.c.bf16 %v439_v21, %v437_v20  ;;  %v293_v24 = vpop.f32.mrb[8].mxu0 }
 0x101   :  { %v294_v25 = vadd.f32 %v293_v24, %v1448_v58  ;;  %v295_v26 = vpop.f32.mrb[9].mxu0 }
 0x102   :  { %v296_v27 = vadd.f32 %v295_v26, %v1452_v59  ;;  %v297_v28 = vpop.f32.mrb[10].mxu0  ;;  %774 = vmatprep.mubr.bf16.mxu1 %v499_v23 }
 0x103   :  { %v298_v29 = vadd.f32 %v297_v28, %v1448_v58  ;;  %v299_v30 = vpop.f32.mrb[11].mxu0  ;;  %775 = vmatmul.mubr.bf16.gmra.mrb[4].mxu1 %v498_v22  ;;  %v440_v32 = vmax.f32 %v294_v25, 0.0 }
 0x104   :  { %v300_v31 = vadd.f32 %v299_v30, %v1452_v59  ;;  %v441_v34 = vmax.f32 %v296_v27, 0.0 }
 0x105   :  { %v442_v33 = vmax.f32 %v298_v29, 0.0 }
 0x106   :  { %v443_v35 = vmax.f32 %v300_v31, 0.0 }
 0x107   :  { %v500_v36 = vpack.c.bf16 %v442_v33, %v440_v32 }
 0x108   :  { %v501_v37 = vpack.c.bf16 %v443_v35, %v441_v34  ;;  %v303_v38 = vpop.f32.mrb[12].mxu0 }
 0x109   :  { %v304_v39 = vadd.f32 %v303_v38, %v1448_v58  ;;  %v305_v40 = vpop.f32.mrb[13].mxu0 }
 0x10a   :  { %v306_v41 = vadd.f32 %v305_v40, %v1452_v59  ;;  %v307_v42 = vpop.f32.mrb[14].mxu0  ;;  %784 = vmatprep.mubr.bf16.mxu1 %v501_v37 }
 0x10b   :  { %v308_v43 = vadd.f32 %v307_v42, %v1448_v58  ;;  %v309_v44 = vpop.f32.mrb[15].mxu0  ;;  %785 = vmatmul.mubr.bf16.gmra.mrb[8].mxu1 %v500_v36  ;;  %v444_v46 = vmax.f32 %v304_v39, 0.0 }
 0x10c   :  { %v310_v45 = vadd.f32 %v309_v44, %v1452_v59  ;;  %v445_v48 = vmax.f32 %v306_v41, 0.0 }
 0x10d   :  { %v446_v47 = vmax.f32 %v308_v43, 0.0 }
 0x10e   :  { %v447_v49 = vmax.f32 %v310_v45, 0.0 }
 0x10f   :  { %v502_v50 = vpack.c.bf16 %v446_v47, %v444_v46 }
 0x110   :  { %v503_v51 = vpack.c.bf16 %v447_v49, %v445_v48  ;;  %v313_v52 = vpop.f32.mrb[16].mxu0 }
 0x111   :  { %v314_v53 = vadd.f32 %v313_v52, %v1448_v58  ;;  %v315_v56 = vpop.f32.mrb[17].mxu0 }
 0x112   :  { %v316_v60 = vadd.f32 %v315_v56, %v1452_v59  ;;  %v317_v61 = vpop.f32.mrb[18].mxu0  ;;  %794 = vmatprep.mubr.bf16.mxu1 %v503_v51 }
 0x113   :  { %v318_v62 = vadd.f32 %v317_v61, %v1448_v58  ;;  %v319_v63 = vpop.f32.mrb[19].mxu0  ;;  %795 = vmatmul.mubr.bf16.gmra.mrb[12].mxu1 %v502_v50  ;;  %v448_v1 = vmax.f32 %v314_v53, 0.0 }
 0x114   :  { %v320_v0 = vadd.f32 %v319_v63, %v1452_v59  ;;  %v449_v3 = vmax.f32 %v316_v60, 0.0 }
 0x115   :  { %v450_v2 = vmax.f32 %v318_v62, 0.0 }
 0x116   :  { %v451_v4 = vmax.f32 %v320_v0, 0.0 }
 0x117   :  { %v504_v5 = vpack.c.bf16 %v450_v2, %v448_v1 }
 0x118   :  { %v505_v6 = vpack.c.bf16 %v451_v4, %v449_v3  ;;  %v323_v7 = vpop.f32.mrb[20].mxu0 }
 0x119   :  { %v324_v8 = vadd.f32 %v323_v7, %v1448_v58  ;;  %v325_v9 = vpop.f32.mrb[21].mxu0 }
 0x11a   :  { %v326_v10 = vadd.f32 %v325_v9, %v1452_v59  ;;  %v327_v11 = vpop.f32.mrb[22].mxu0  ;;  %804 = vmatprep.mubr.bf16.mxu1 %v505_v6 }
 0x11b   :  { %v328_v12 = vadd.f32 %v327_v11, %v1448_v58  ;;  %v329_v13 = vpop.f32.mrb[23].mxu0  ;;  %805 = vmatmul.mubr.bf16.gmra.mrb[16].mxu1 %v504_v5  ;;  %v452_v15 = vmax.f32 %v324_v8, 0.0 }
 0x11c   :  { %v330_v14 = vadd.f32 %v329_v13, %v1452_v59  ;;  %v453_v17 = vmax.f32 %v326_v10, 0.0 }
 0x11d   :  { %v454_v16 = vmax.f32 %v328_v12, 0.0 }
 0x11e   :  { %v455_v18 = vmax.f32 %v330_v14, 0.0 }
 0x11f   :  { %v506_v19 = vpack.c.bf16 %v454_v16, %v452_v15 }
 0x120   :  { %v507_v20 = vpack.c.bf16 %v455_v18, %v453_v17  ;;  %v333_v21 = vpop.f32.mrb[24].mxu0 }
 0x121   :  { %v334_v22 = vadd.f32 %v333_v21, %v1448_v58  ;;  %v335_v23 = vpop.f32.mrb[25].mxu0 }
 0x122   :  { %v336_v24 = vadd.f32 %v335_v23, %v1452_v59  ;;  %v337_v25 = vpop.f32.mrb[26].mxu0  ;;  %814 = vmatprep.mubr.bf16.mxu1 %v507_v20 }
 0x123   :  { %v338_v26 = vadd.f32 %v337_v25, %v1448_v58  ;;  %v339_v27 = vpop.f32.mrb[27].mxu0  ;;  %815 = vmatmul.mubr.bf16.gmra.mrb[20].mxu1 %v506_v19  ;;  %v456_v29 = vmax.f32 %v334_v22, 0.0 }
 0x124   :  { %v340_v28 = vadd.f32 %v339_v27, %v1452_v59  ;;  %v457_v31 = vmax.f32 %v336_v24, 0.0 }
 0x125   :  { %v458_v30 = vmax.f32 %v338_v26, 0.0 }
 0x126   :  { %v459_v32 = vmax.f32 %v340_v28, 0.0 }
 0x127   :  { %v508_v33 = vpack.c.bf16 %v458_v30, %v456_v29 }
 0x128   :  { %v509_v34 = vpack.c.bf16 %v459_v32, %v457_v31  ;;  %v343_v35 = vpop.f32.mrb[28].mxu0 }
 0x129   :  { %v344_v36 = vadd.f32 %v343_v35, %v1448_v58  ;;  %v345_v37 = vpop.f32.mrb[29].mxu0 }
 0x12a   :  { %v346_v38 = vadd.f32 %v345_v37, %v1452_v59  ;;  %v347_v39 = vpop.f32.mrb[30].mxu0  ;;  %824 = vmatprep.mubr.bf16.mxu1 %v509_v34 }
 0x12b   :  { %v348_v40 = vadd.f32 %v347_v39, %v1448_v58  ;;  %v349_v41 = vpop.f32.mrb[31].mxu0  ;;  %825 = vmatmul.mubr.bf16.gmra.mrb[24].mxu1 %v508_v33  ;;  %v460_v43 = vmax.f32 %v344_v36, 0.0 }
 0x12c   :  { %v350_v42 = vadd.f32 %v349_v41, %v1452_v59  ;;  %v461_v45 = vmax.f32 %v346_v38, 0.0 }
 0x12d   :  { %v462_v44 = vmax.f32 %v348_v40, 0.0 }
 0x12e   :  { %v463_v46 = vmax.f32 %v350_v42, 0.0 }
 0x12f   :  { %v510_v47 = vpack.c.bf16 %v462_v44, %v460_v43 }
 0x130   :  { %v511_v48 = vpack.c.bf16 %v463_v46, %v461_v45  ;;  %v353_v49 = vpop.f32.mrb[32].mxu0 }
 0x131   :  { %v354_v50 = vadd.f32 %v353_v49, %v1448_v58  ;;  %v355_v51 = vpop.f32.mrb[33].mxu0 }
 0x132   :  { %v356_v52 = vadd.f32 %v355_v51, %v1452_v59  ;;  %v357_v53 = vpop.f32.mrb[34].mxu0  ;;  %834 = vmatprep.mubr.bf16.mxu1 %v511_v48 }
 0x133   :  { %v358_v56 = vadd.f32 %v357_v53, %v1448_v58  ;;  %v359_v60 = vpop.f32.mrb[35].mxu0  ;;  %835 = vmatmul.mubr.bf16.gmra.mrb[28].mxu1 %v510_v47  ;;  %v464_v62 = vmax.f32 %v354_v50, 0.0 }
 0x134   :  { %v360_v61 = vadd.f32 %v359_v60, %v1452_v59  ;;  %v465_v0 = vmax.f32 %v356_v52, 0.0 }
 0x135   :  { %v466_v63 = vmax.f32 %v358_v56, 0.0 }
 0x136   :  { %v467_v1 = vmax.f32 %v360_v61, 0.0 }
 0x137   :  { %v512_v2 = vpack.c.bf16 %v466_v63, %v464_v62 }
 0x138   :  { %v513_v3 = vpack.c.bf16 %v467_v1, %v465_v0  ;;  %v363_v4 = vpop.f32.mrb[36].mxu0 }
 0x139   :  { %v364_v5 = vadd.f32 %v363_v4, %v1448_v58  ;;  %v365_v6 = vpop.f32.mrb[37].mxu0 }
 0x13a   :  { %v366_v7 = vadd.f32 %v365_v6, %v1452_v59  ;;  %v367_v8 = vpop.f32.mrb[38].mxu0  ;;  %844 = vmatprep.mubr.bf16.mxu1 %v513_v3 }
 0x13b   :  { %v368_v9 = vadd.f32 %v367_v8, %v1448_v58  ;;  %v369_v10 = vpop.f32.mrb[39].mxu0  ;;  %845 = vmatmul.mubr.bf16.gmra.mrb[32].mxu1 %v512_v2  ;;  %v468_v12 = vmax.f32 %v364_v5, 0.0 }
 0x13c   :  { %v370_v11 = vadd.f32 %v369_v10, %v1452_v59  ;;  %v469_v14 = vmax.f32 %v366_v7, 0.0 }
 0x13d   :  { %v470_v13 = vmax.f32 %v368_v9, 0.0 }
 0x13e   :  { %v471_v15 = vmax.f32 %v370_v11, 0.0 }
 0x13f   :  { %v514_v16 = vpack.c.bf16 %v470_v13, %v468_v12 }
 0x140   :  { %v515_v17 = vpack.c.bf16 %v471_v15, %v469_v14  ;;  %v373_v18 = vpop.f32.mrb[40].mxu0 }
 0x141   :  { %v374_v19 = vadd.f32 %v373_v18, %v1448_v58  ;;  %v375_v20 = vpop.f32.mrb[41].mxu0 }
 0x142   :  { %v376_v21 = vadd.f32 %v375_v20, %v1452_v59  ;;  %v377_v22 = vpop.f32.mrb[42].mxu0  ;;  %854 = vmatprep.mubr.bf16.mxu1 %v515_v17 }
 0x143   :  { %v378_v23 = vadd.f32 %v377_v22, %v1448_v58  ;;  %v379_v24 = vpop.f32.mrb[43].mxu0  ;;  %855 = vmatmul.mubr.bf16.gmra.mrb[36].mxu1 %v514_v16  ;;  %v472_v26 = vmax.f32 %v374_v19, 0.0 }
 0x144   :  { %v380_v25 = vadd.f32 %v379_v24, %v1452_v59  ;;  %v473_v28 = vmax.f32 %v376_v21, 0.0 }
 0x145   :  { %v474_v27 = vmax.f32 %v378_v23, 0.0 }
 0x146   :  { %v475_v29 = vmax.f32 %v380_v25, 0.0 }
 0x147   :  { %v516_v30 = vpack.c.bf16 %v474_v27, %v472_v26 }
 0x148   :  { %v517_v31 = vpack.c.bf16 %v475_v29, %v473_v28  ;;  %v383_v32 = vpop.f32.mrb[44].mxu0 }
 0x149   :  { %v384_v33 = vadd.f32 %v383_v32, %v1448_v58  ;;  %v385_v34 = vpop.f32.mrb[45].mxu0 }
 0x14a   :  { %v386_v35 = vadd.f32 %v385_v34, %v1452_v59  ;;  %v387_v36 = vpop.f32.mrb[46].mxu0  ;;  %864 = vmatprep.mubr.bf16.mxu1 %v517_v31 }
 0x14b   :  { %v388_v37 = vadd.f32 %v387_v36, %v1448_v58  ;;  %v389_v38 = vpop.f32.mrb[47].mxu0  ;;  %865 = vmatmul.mubr.bf16.gmra.mrb[40].mxu1 %v516_v30  ;;  %v476_v40 = vmax.f32 %v384_v33, 0.0 }
 0x14c   :  { %v390_v39 = vadd.f32 %v389_v38, %v1452_v59  ;;  %v477_v42 = vmax.f32 %v386_v35, 0.0 }
 0x14d   :  { %v478_v41 = vmax.f32 %v388_v37, 0.0 }
 0x14e   :  { %v479_v43 = vmax.f32 %v390_v39, 0.0 }
 0x14f   :  { %v518_v44 = vpack.c.bf16 %v478_v41, %v476_v40 }
 0x150   :  { %v519_v45 = vpack.c.bf16 %v479_v43, %v477_v42  ;;  %v393_v46 = vpop.f32.mrb[48].mxu0  ;;  %v560_v43 = vld [vmem:[%s1621_s4] sm:$0x3] }
 0x151   :  { %v394_v47 = vadd.f32 %v393_v46, %v1448_v58  ;;  %v395_v48 = vpop.f32.mrb[49].mxu0 }
 0x152   :  { %v396_v49 = vadd.f32 %v395_v48, %v1452_v59  ;;  %v397_v50 = vpop.f32.mrb[50].mxu0  ;;  %874 = vmatprep.mubr.bf16.mxu1 %v519_v45 }
 0x153   :  { %v398_v51 = vadd.f32 %v397_v50, %v1448_v58  ;;  %v399_v52 = vpop.f32.mrb[51].mxu0  ;;  %875 = vmatmul.mubr.bf16.gmra.mrb[44].mxu1 %v518_v44  ;;  %v480_v56 = vmax.f32 %v394_v47, 0.0  ;;  %v1523_v44 = vrot.slane %v560_v43, %v82_v55 }
 0x154   :  { %v400_v53 = vadd.f32 %v399_v52, %v1452_v59  ;;  %v481_v61 = vmax.f32 %v396_v49, 0.0 }
 0x155   :  { %v482_v60 = vmax.f32 %v398_v51, 0.0  ;;  %v1535_v51 = vld [vmem:[%s1622_s5] sm:$0xff] }
 0x156   :  { %v483_v62 = vmax.f32 %v400_v53, 0.0  ;;  %v1162_v54 = vcombine.high %v1535_v51, %v1535_v51 }
 0x157   :  { %v520_v63 = vpack.c.bf16 %v482_v60, %v480_v56 }
 0x158   :  { %v521_v0 = vpack.c.bf16 %v483_v62, %v481_v61  ;;  %v403_v1 = vpop.f32.mrb[52].mxu0  ;;  %1067 = vmatprep.mubr.bf16.mxu0 %v1162_v54 }
 0x159   :  { %v404_v2 = vadd.f32 %v403_v1, %v1448_v58  ;;  %v405_v3 = vpop.f32.mrb[53].mxu0 }
 0x15a   :  { %v406_v4 = vadd.f32 %v405_v3, %v1452_v59  ;;  %v407_v5 = vpop.f32.mrb[54].mxu0  ;;  %884 = vmatprep.mubr.bf16.mxu1 %v521_v0  ;;  %v1022_v3 = vld [vmem:[%s1623_s6] sm:$0xff]  ;;  %s1293_s6 = smov [#allocation5]  }
 0x15b   :  { %v408_v6 = vadd.f32 %v407_v5, %v1448_v58  ;;  %v409_v7 = vpop.f32.mrb[55].mxu0  ;;  %885 = vmatmul.mubr.bf16.gmra.mrb[48].mxu1 %v520_v63  ;;  %v484_v9 = vmax.f32 %v404_v2, 0.0  ;;  %1025 = vperm.xlu0 %1168, %v1022_v3   ;;  %s1084_s9 = sshll.u32 %s1293_s6, 4  ;;  %s1085_s9 = int_to_ptr.vmem [resolvable:$true] %s1084_s9 }
 0x15c   :  { %v410_v8 = vadd.f32 %v409_v7, %v1452_v59  ;;  %v485_v11 = vmax.f32 %v406_v4, 0.0  ;;  %s1263_s10 = scalar_lea.vmem %s1085_s9, 256  ;;  %p1268_p9 = scmp.lt.s32.totalorder %s1085_s9, %s1085_s9 }
 0x15d   :  { %v486_v10 = vmax.f32 %v408_v6, 0.0  ;;  %p1264_p8 = scmp.ne.s32.totalorder %s1085_s9, %s1263_s10  ;;  %p1269_p10 = scmp.lt.s32.totalorder %s1263_s10, %s1263_s10 }
 0x15e   :  { %v487_v12 = vmax.f32 %v410_v8, 0.0 }
 0x15f   :  { %v522_v13 = vpack.c.bf16 %v486_v10, %v484_v9  ;;  %p1270_p11 = por %p1269_p10, %p1268_p9 }
 0x160   :  { %v523_v14 = vpack.c.bf16 %v487_v12, %v485_v11  ;;  %v413_v15 = vpop.f32.mrb[56].mxu0 }
 0x161   :  { %v414_v16 = vadd.f32 %v413_v15, %v1448_v58  ;;  %v415_v17 = vpop.f32.mrb[57].mxu0  ;;  %p1271_p12 = pnand %p1270_p11, %p1264_p8 }
 0x162   :  { %v416_v18 = vadd.f32 %v415_v17, %v1452_v59  ;;  %v417_v19 = vpop.f32.mrb[58].mxu0  ;;  %894 = vmatprep.mubr.bf16.mxu1 %v523_v14 }
 0x163   :  { %v418_v20 = vadd.f32 %v417_v19, %v1448_v58  ;;  %v419_v21 = vpop.f32.mrb[59].mxu0  ;;  %895 = vmatmul.mubr.bf16.gmra.mrb[52].mxu1 %v522_v13  ;;  %v488_v23 = vmax.f32 %v414_v16, 0.0 }
 0x164   :  { %v420_v22 = vadd.f32 %v419_v21, %v1452_v59  ;;  %v489_v25 = vmax.f32 %v416_v18, 0.0 }
 0x165   :  { %v490_v24 = vmax.f32 %v418_v20, 0.0 }
 0x166   :  { %v491_v26 = vmax.f32 %v420_v22, 0.0 }
 0x167   :  { %v524_v27 = vpack.c.bf16 %v490_v24, %v488_v23 }
 0x168   :  { %v525_v28 = vpack.c.bf16 %v491_v26, %v489_v25  ;;  %v423_v29 = vpop.f32.mrb[60].mxu0 }
 0x169   :  { %v424_v30 = vadd.f32 %v423_v29, %v1448_v58  ;;  %v425_v31 = vpop.f32.mrb[61].mxu0 }
 0x16a   :  { %v426_v32 = vadd.f32 %v425_v31, %v1452_v59  ;;  %v427_v33 = vpop.f32.mrb[62].mxu0  ;;  %904 = vmatprep.mubr.bf16.mxu1 %v525_v28 }
 0x16b   :  { %v428_v34 = vadd.f32 %v427_v33, %v1448_v58  ;;  %v429_v35 = vpop.f32.mrb[63].mxu0  ;;  %905 = vmatmul.mubr.bf16.gmra.mrb[56].mxu1 %v524_v27  ;;  %v492_v37 = vmax.f32 %v424_v30, 0.0  ;;  %v1527_v58 = vrot.slane %v560_v43, %v86_v57 }
 0x16c   :  { %v430_v36 = vadd.f32 %v429_v35, %v1452_v59  ;;  %v493_v39 = vmax.f32 %v426_v32, 0.0 }
 0x16d   :  { %v494_v38 = vmax.f32 %v428_v34, 0.0 }
 0x16e   :  { %v495_v40 = vmax.f32 %v430_v36, 0.0 }
 0x16f   :  { %v526_v41 = vpack.c.bf16 %v494_v38, %v492_v37 }
 0x170   :  { %v527_v42 = vpack.c.bf16 %v495_v40, %v493_v39 }
 0x172   :  { %914 = vmatprep.mubr.bf16.mxu1 %v527_v42 }
 0x173   :  { %915 = vmatmul.mubr.bf16.gmra.mrb[60].mxu1 %v526_v41 }
 0x1ce   :  { %v766_v59 = vpop.f32.mrb[0].mxu1 }
 0x1cf   :  { %v767_v45 = vadd.f32 %v766_v59, %v1523_v44  ;;  %v768_v46 = vpop.f32.mrb[1].mxu1 }
 0x1d0   :  { %v769_v47 = vadd.f32 %v768_v46, %v1527_v58  ;;  %v770_v48 = vpop.f32.mrb[2].mxu1 }
 0x1d1   :  { %v771_v49 = vadd.f32 %v770_v48, %v1523_v44  ;;  %v772_v50 = vpop.f32.mrb[3].mxu1  ;;  %v925_v57 = vmax.f32 %v767_v45, 0.0 }
 0x1d2   :  { %v773_v55 = vadd.f32 %v772_v50, %v1527_v58  ;;  %v926_v53 = vmax.f32 %v769_v47, 0.0 }
 0x1d3   :  { %v927_v52 = vmax.f32 %v771_v49, 0.0 }
 0x1d4   :  { %v928_v56 = vmax.f32 %v773_v55, 0.0 }
 0x1d5   :  { %v989_v60 = vpack.c.bf16 %v927_v52, %v925_v57 }
 0x1d6   :  { %v990_v61 = vpack.c.bf16 %v928_v56, %v926_v53  ;;  %v776_v62 = vpop.f32.mrb[4].mxu1 }
 0x1d7   :  { %v777_v63 = vadd.f32 %v776_v62, %v1523_v44  ;;  %v778_v0 = vpop.f32.mrb[5].mxu1 }
 0x1d8   :  { %v779_v1 = vadd.f32 %v778_v0, %v1527_v58  ;;  %v780_v2 = vpop.f32.mrb[6].mxu1  ;;  %1035 = vmatprep.subr.bf16.mxu0 %v990_v61 }
 0x1d9   :  { %v781_v4 = vadd.f32 %v780_v2, %v1523_v44  ;;  %v782_v5 = vpop.f32.mrb[7].mxu1  ;;  %1036 = vmatpush1.bf16.xpose.msra.mxu0 %v989_v60  ;;  %v929_v7 = vmax.f32 %v777_v63, 0.0 }
 0x1da   :  { %v783_v6 = vadd.f32 %v782_v5, %v1527_v58  ;;  %v930_v9 = vmax.f32 %v779_v1, 0.0 }
 0x1db   :  { %v931_v8 = vmax.f32 %v781_v4, 0.0 }
 0x1dc   :  { %v932_v10 = vmax.f32 %v783_v6, 0.0 }
 0x1dd   :  { %v991_v11 = vpack.c.bf16 %v931_v8, %v929_v7 }
 0x1de   :  { %v992_v12 = vpack.c.bf16 %v932_v10, %v930_v9  ;;  %v786_v13 = vpop.f32.mrb[8].mxu1 }
 0x1df   :  { %v787_v14 = vadd.f32 %v786_v13, %v1523_v44  ;;  %v788_v15 = vpop.f32.mrb[9].mxu1 }
 0x1e0   :  { %v789_v16 = vadd.f32 %v788_v15, %v1527_v58  ;;  %v790_v17 = vpop.f32.mrb[10].mxu1  ;;  %1037 = vmatprep.subr.bf16.mxu0 %v992_v12 }
 0x1e1   :  { %v791_v18 = vadd.f32 %v790_v17, %v1523_v44  ;;  %v792_v19 = vpop.f32.mrb[11].mxu1  ;;  %1038 = vmatpush1.bf16.xpose.msra.mxu0 %v991_v11  ;;  %v933_v21 = vmax.f32 %v787_v14, 0.0 }
 0x1e2   :  { %v793_v20 = vadd.f32 %v792_v19, %v1527_v58  ;;  %v934_v23 = vmax.f32 %v789_v16, 0.0 }
 0x1e3   :  { %v935_v22 = vmax.f32 %v791_v18, 0.0 }
 0x1e4   :  { %v936_v24 = vmax.f32 %v793_v20, 0.0 }
 0x1e5   :  { %v993_v25 = vpack.c.bf16 %v935_v22, %v933_v21 }
 0x1e6   :  { %v994_v26 = vpack.c.bf16 %v936_v24, %v934_v23  ;;  %v796_v27 = vpop.f32.mrb[12].mxu1 }
 0x1e7   :  { %v797_v28 = vadd.f32 %v796_v27, %v1523_v44  ;;  %v798_v29 = vpop.f32.mrb[13].mxu1 }
 0x1e8   :  { %v799_v30 = vadd.f32 %v798_v29, %v1527_v58  ;;  %v800_v31 = vpop.f32.mrb[14].mxu1  ;;  %1039 = vmatprep.subr.bf16.mxu0 %v994_v26 }
 0x1e9   :  { %v801_v32 = vadd.f32 %v800_v31, %v1523_v44  ;;  %v802_v33 = vpop.f32.mrb[15].mxu1  ;;  %1040 = vmatpush1.bf16.xpose.msra.mxu0 %v993_v25  ;;  %v937_v35 = vmax.f32 %v797_v28, 0.0 }
 0x1ea   :  { %v803_v34 = vadd.f32 %v802_v33, %v1527_v58  ;;  %v938_v37 = vmax.f32 %v799_v30, 0.0 }
 0x1eb   :  { %v939_v36 = vmax.f32 %v801_v32, 0.0 }
 0x1ec   :  { %v940_v38 = vmax.f32 %v803_v34, 0.0 }
 0x1ed   :  { %v995_v39 = vpack.c.bf16 %v939_v36, %v937_v35 }
 0x1ee   :  { %v996_v40 = vpack.c.bf16 %v940_v38, %v938_v37  ;;  %v806_v41 = vpop.f32.mrb[16].mxu1 }
 0x1ef   :  { %v807_v42 = vadd.f32 %v806_v41, %v1523_v44  ;;  %v808_v43 = vpop.f32.mrb[17].mxu1 }
 0x1f0   :  { %v809_v59 = vadd.f32 %v808_v43, %v1527_v58  ;;  %v810_v45 = vpop.f32.mrb[18].mxu1  ;;  %1041 = vmatprep.subr.bf16.mxu0 %v996_v40 }
 0x1f1   :  { %v811_v46 = vadd.f32 %v810_v45, %v1523_v44  ;;  %v812_v47 = vpop.f32.mrb[19].mxu1  ;;  %1042 = vmatpush1.bf16.xpose.msra.mxu0 %v995_v39  ;;  %v941_v49 = vmax.f32 %v807_v42, 0.0 }
 0x1f2   :  { %v813_v48 = vadd.f32 %v812_v47, %v1527_v58  ;;  %v942_v55 = vmax.f32 %v809_v59, 0.0 }
 0x1f3   :  { %v943_v50 = vmax.f32 %v811_v46, 0.0 }
 0x1f4   :  { %v944_v54 = vmax.f32 %v813_v48, 0.0 }
 0x1f5   :  { %v997_v57 = vpack.c.bf16 %v943_v50, %v941_v49 }
 0x1f6   :  { %v998_v52 = vpack.c.bf16 %v944_v54, %v942_v55  ;;  %v816_v53 = vpop.f32.mrb[20].mxu1 }
 0x1f7   :  { %v817_v56 = vadd.f32 %v816_v53, %v1523_v44  ;;  %v818_v60 = vpop.f32.mrb[21].mxu1 }
 0x1f8   :  { %v819_v61 = vadd.f32 %v818_v60, %v1527_v58  ;;  %v820_v62 = vpop.f32.mrb[22].mxu1  ;;  %1043 = vmatprep.subr.bf16.mxu0 %v998_v52 }
 0x1f9   :  { %v821_v63 = vadd.f32 %v820_v62, %v1523_v44  ;;  %v822_v0 = vpop.f32.mrb[23].mxu1  ;;  %1044 = vmatpush1.bf16.xpose.msra.mxu0 %v997_v57  ;;  %v945_v2 = vmax.f32 %v817_v56, 0.0 }
 0x1fa   :  { %v823_v1 = vadd.f32 %v822_v0, %v1527_v58  ;;  %v946_v4 = vmax.f32 %v819_v61, 0.0 }
 0x1fb   :  { %v947_v3 = vmax.f32 %v821_v63, 0.0 }
 0x1fc   :  { %v948_v5 = vmax.f32 %v823_v1, 0.0 }
 0x1fd   :  { %v999_v6 = vpack.c.bf16 %v947_v3, %v945_v2 }
 0x1fe   :  { %v1000_v7 = vpack.c.bf16 %v948_v5, %v946_v4  ;;  %v826_v8 = vpop.f32.mrb[24].mxu1 }
 0x1ff   :  { %v827_v9 = vadd.f32 %v826_v8, %v1523_v44  ;;  %v828_v10 = vpop.f32.mrb[25].mxu1 }
 0x200   :  { %v829_v11 = vadd.f32 %v828_v10, %v1527_v58  ;;  %v830_v12 = vpop.f32.mrb[26].mxu1  ;;  %1045 = vmatprep.subr.bf16.mxu0 %v1000_v7 }
 0x201   :  { %v831_v13 = vadd.f32 %v830_v12, %v1523_v44  ;;  %v832_v14 = vpop.f32.mrb[27].mxu1  ;;  %1046 = vmatpush1.bf16.xpose.msra.mxu0 %v999_v6  ;;  %v949_v16 = vmax.f32 %v827_v9, 0.0 }
 0x202   :  { %v833_v15 = vadd.f32 %v832_v14, %v1527_v58  ;;  %v950_v18 = vmax.f32 %v829_v11, 0.0 }
 0x203   :  { %v951_v17 = vmax.f32 %v831_v13, 0.0 }
 0x204   :  { %v952_v19 = vmax.f32 %v833_v15, 0.0 }
 0x205   :  { %v1001_v20 = vpack.c.bf16 %v951_v17, %v949_v16 }
 0x206   :  { %v1002_v21 = vpack.c.bf16 %v952_v19, %v950_v18  ;;  %v836_v22 = vpop.f32.mrb[28].mxu1 }
 0x207   :  { %v837_v23 = vadd.f32 %v836_v22, %v1523_v44  ;;  %v838_v24 = vpop.f32.mrb[29].mxu1 }
 0x208   :  { %v839_v25 = vadd.f32 %v838_v24, %v1527_v58  ;;  %v840_v26 = vpop.f32.mrb[30].mxu1  ;;  %1047 = vmatprep.subr.bf16.mxu0 %v1002_v21 }
 0x209   :  { %v841_v27 = vadd.f32 %v840_v26, %v1523_v44  ;;  %v842_v28 = vpop.f32.mrb[31].mxu1  ;;  %1048 = vmatpush1.bf16.xpose.msra.mxu0 %v1001_v20  ;;  %v953_v30 = vmax.f32 %v837_v23, 0.0 }
 0x20a   :  { %v843_v29 = vadd.f32 %v842_v28, %v1527_v58  ;;  %v954_v32 = vmax.f32 %v839_v25, 0.0 }
 0x20b   :  { %v955_v31 = vmax.f32 %v841_v27, 0.0 }
 0x20c   :  { %v956_v33 = vmax.f32 %v843_v29, 0.0 }
 0x20d   :  { %v1003_v34 = vpack.c.bf16 %v955_v31, %v953_v30 }
 0x20e   :  { %v1004_v35 = vpack.c.bf16 %v956_v33, %v954_v32  ;;  %v846_v36 = vpop.f32.mrb[32].mxu1 }
 0x20f   :  { %v847_v37 = vadd.f32 %v846_v36, %v1523_v44  ;;  %v848_v38 = vpop.f32.mrb[33].mxu1 }
 0x210   :  { %v849_v39 = vadd.f32 %v848_v38, %v1527_v58  ;;  %v850_v40 = vpop.f32.mrb[34].mxu1  ;;  %1049 = vmatprep.subr.bf16.mxu0 %v1004_v35 }
 0x211   :  { %v851_v41 = vadd.f32 %v850_v40, %v1523_v44  ;;  %v852_v42 = vpop.f32.mrb[35].mxu1  ;;  %1050 = vmatpush1.bf16.xpose.msra.mxu0 %v1003_v34  ;;  %v957_v59 = vmax.f32 %v847_v37, 0.0 }
 0x212   :  { %v853_v43 = vadd.f32 %v852_v42, %v1527_v58  ;;  %v958_v46 = vmax.f32 %v849_v39, 0.0 }
 0x213   :  { %v959_v45 = vmax.f32 %v851_v41, 0.0 }
 0x214   :  { %v960_v47 = vmax.f32 %v853_v43, 0.0 }
 0x215   :  { %v1005_v48 = vpack.c.bf16 %v959_v45, %v957_v59 }
 0x216   :  { %v1006_v49 = vpack.c.bf16 %v960_v47, %v958_v46  ;;  %v856_v50 = vpop.f32.mrb[36].mxu1 }
 0x217   :  { %v857_v55 = vadd.f32 %v856_v50, %v1523_v44  ;;  %v858_v54 = vpop.f32.mrb[37].mxu1 }
 0x218   :  { %v859_v57 = vadd.f32 %v858_v54, %v1527_v58  ;;  %v860_v52 = vpop.f32.mrb[38].mxu1  ;;  %1051 = vmatprep.subr.bf16.mxu0 %v1006_v49 }
 0x219   :  { %v861_v53 = vadd.f32 %v860_v52, %v1523_v44  ;;  %v862_v56 = vpop.f32.mrb[39].mxu1  ;;  %1052 = vmatpush1.bf16.xpose.msra.mxu0 %v1005_v48  ;;  %v961_v61 = vmax.f32 %v857_v55, 0.0 }
 0x21a   :  { %v863_v60 = vadd.f32 %v862_v56, %v1527_v58  ;;  %v962_v63 = vmax.f32 %v859_v57, 0.0 }
 0x21b   :  { %v963_v62 = vmax.f32 %v861_v53, 0.0 }
 0x21c   :  { %v964_v0 = vmax.f32 %v863_v60, 0.0 }
 0x21d   :  { %v1007_v1 = vpack.c.bf16 %v963_v62, %v961_v61 }
 0x21e   :  { %v1008_v2 = vpack.c.bf16 %v964_v0, %v962_v63  ;;  %v866_v3 = vpop.f32.mrb[40].mxu1 }
 0x21f   :  { %v867_v4 = vadd.f32 %v866_v3, %v1523_v44  ;;  %v868_v5 = vpop.f32.mrb[41].mxu1 }
 0x220   :  { %v869_v6 = vadd.f32 %v868_v5, %v1527_v58  ;;  %v870_v7 = vpop.f32.mrb[42].mxu1  ;;  %1053 = vmatprep.subr.bf16.mxu0 %v1008_v2 }
 0x221   :  { %v871_v8 = vadd.f32 %v870_v7, %v1523_v44  ;;  %v872_v9 = vpop.f32.mrb[43].mxu1  ;;  %1054 = vmatpush1.bf16.xpose.msra.mxu0 %v1007_v1  ;;  %v965_v11 = vmax.f32 %v867_v4, 0.0 }
 0x222   :  { %v873_v10 = vadd.f32 %v872_v9, %v1527_v58  ;;  %v966_v13 = vmax.f32 %v869_v6, 0.0 }
 0x223   :  { %v967_v12 = vmax.f32 %v871_v8, 0.0 }
 0x224   :  { %v968_v14 = vmax.f32 %v873_v10, 0.0 }
 0x225   :  { %v1009_v15 = vpack.c.bf16 %v967_v12, %v965_v11 }
 0x226   :  { %v1010_v16 = vpack.c.bf16 %v968_v14, %v966_v13  ;;  %v876_v17 = vpop.f32.mrb[44].mxu1 }
 0x227   :  { %v877_v18 = vadd.f32 %v876_v17, %v1523_v44  ;;  %v878_v19 = vpop.f32.mrb[45].mxu1 }
 0x228   :  { %v879_v20 = vadd.f32 %v878_v19, %v1527_v58  ;;  %v880_v21 = vpop.f32.mrb[46].mxu1  ;;  %1055 = vmatprep.subr.bf16.mxu0 %v1010_v16 }
 0x229   :  { %v881_v22 = vadd.f32 %v880_v21, %v1523_v44  ;;  %v882_v23 = vpop.f32.mrb[47].mxu1  ;;  %1056 = vmatpush1.bf16.xpose.msra.mxu0 %v1009_v15  ;;  %v969_v25 = vmax.f32 %v877_v18, 0.0 }
 0x22a   :  { %v883_v24 = vadd.f32 %v882_v23, %v1527_v58  ;;  %v970_v27 = vmax.f32 %v879_v20, 0.0 }
 0x22b   :  { %v971_v26 = vmax.f32 %v881_v22, 0.0 }
 0x22c   :  { %v972_v28 = vmax.f32 %v883_v24, 0.0 }
 0x22d   :  { %v1011_v29 = vpack.c.bf16 %v971_v26, %v969_v25  ;;  %v1161_v26 = vcombine.low %v1535_v51, %v1535_v51 }
 0x22e   :  { %v1012_v30 = vpack.c.bf16 %v972_v28, %v970_v27  ;;  %v886_v31 = vpop.f32.mrb[48].mxu1  ;;  %v1026_v27 = vpop.permute.xlu0 %1025 }
 0x22f   :  { %v887_v32 = vadd.f32 %v886_v31, %v1523_v44  ;;  %v888_v33 = vpop.f32.mrb[49].mxu1 }
 0x230   :  { %v889_v34 = vadd.f32 %v888_v33, %v1527_v58  ;;  %v890_v35 = vpop.f32.mrb[50].mxu1  ;;  %1057 = vmatprep.subr.bf16.mxu0 %v1012_v30 }
 0x231   :  { %v891_v36 = vadd.f32 %v890_v35, %v1523_v44  ;;  %v892_v37 = vpop.f32.mrb[51].mxu1  ;;  %1058 = vmatpush1.bf16.xpose.msra.mxu0 %v1011_v29  ;;  %v973_v39 = vmax.f32 %v887_v32, 0.0 }
 0x232   :  { %v893_v38 = vadd.f32 %v892_v37, %v1527_v58  ;;  %v974_v41 = vmax.f32 %v889_v34, 0.0 }
 0x233   :  { %v975_v40 = vmax.f32 %v891_v36, 0.0 }
 0x234   :  { %v976_v42 = vmax.f32 %v893_v38, 0.0 }
 0x235   :  { %v1013_v43 = vpack.c.bf16 %v975_v40, %v973_v39 }
 0x236   :  { %v1014_v59 = vpack.c.bf16 %v976_v42, %v974_v41  ;;  %v896_v45 = vpop.f32.mrb[52].mxu1 }
 0x237   :  { %v897_v46 = vadd.f32 %v896_v45, %v1523_v44  ;;  %v898_v47 = vpop.f32.mrb[53].mxu1 }
 0x238   :  { %v899_v48 = vadd.f32 %v898_v47, %v1527_v58  ;;  %v900_v49 = vpop.f32.mrb[54].mxu1  ;;  %1059 = vmatprep.subr.bf16.mxu0 %v1014_v59 }
 0x239   :  { %v901_v50 = vadd.f32 %v900_v49, %v1523_v44  ;;  %v902_v55 = vpop.f32.mrb[55].mxu1  ;;  %1060 = vmatpush1.bf16.xpose.msra.mxu0 %v1013_v43  ;;  %v977_v57 = vmax.f32 %v897_v46, 0.0 }
 0x23a   :  { %v903_v54 = vadd.f32 %v902_v55, %v1527_v58  ;;  %v978_v53 = vmax.f32 %v899_v48, 0.0 }
 0x23b   :  { %v979_v52 = vmax.f32 %v901_v50, 0.0 }
 0x23c   :  { %v980_v56 = vmax.f32 %v903_v54, 0.0 }
 0x23d   :  { %v1015_v60 = vpack.c.bf16 %v979_v52, %v977_v57 }
 0x23e   :  { %v1016_v61 = vpack.c.bf16 %v980_v56, %v978_v53  ;;  %v906_v62 = vpop.f32.mrb[56].mxu1 }
 0x23f   :  { %v907_v63 = vadd.f32 %v906_v62, %v1523_v44  ;;  %v908_v0 = vpop.f32.mrb[57].mxu1 }
 0x240   :  { %v909_v1 = vadd.f32 %v908_v0, %v1527_v58  ;;  %v910_v2 = vpop.f32.mrb[58].mxu1  ;;  %1061 = vmatprep.subr.bf16.mxu0 %v1016_v61 }
 0x241   :  { %v911_v3 = vadd.f32 %v910_v2, %v1523_v44  ;;  %v912_v4 = vpop.f32.mrb[59].mxu1  ;;  %1062 = vmatpush1.bf16.xpose.msra.mxu0 %v1015_v60  ;;  %v981_v6 = vmax.f32 %v907_v63, 0.0 }
 0x242   :  { %v913_v5 = vadd.f32 %v912_v4, %v1527_v58  ;;  %v982_v8 = vmax.f32 %v909_v1, 0.0 }
 0x243   :  { %v983_v7 = vmax.f32 %v911_v3, 0.0 }
 0x244   :  { %v984_v9 = vmax.f32 %v913_v5, 0.0 }
 0x245   :  { %v1017_v10 = vpack.c.bf16 %v983_v7, %v981_v6 }
 0x246   :  { %v1018_v11 = vpack.c.bf16 %v984_v9, %v982_v8  ;;  %v916_v12 = vpop.f32.mrb[60].mxu1 }
 0x247   :  { %v917_v13 = vadd.f32 %v916_v12, %v1523_v44  ;;  %v918_v14 = vpop.f32.mrb[61].mxu1 }
 0x248   :  { %v919_v15 = vadd.f32 %v918_v14, %v1527_v58  ;;  %v920_v16 = vpop.f32.mrb[62].mxu1  ;;  %1063 = vmatprep.subr.bf16.mxu0 %v1018_v11 }
 0x249   :  { %v921_v17 = vadd.f32 %v920_v16, %v1523_v44  ;;  %v922_v18 = vpop.f32.mrb[63].mxu1  ;;  %1064 = vmatpush1.bf16.xpose.msra.mxu0 %v1017_v10  ;;  %v985_v20 = vmax.f32 %v917_v13, 0.0 }
 0x24a   :  { %v923_v19 = vadd.f32 %v922_v18, %v1527_v58  ;;  %v986_v22 = vmax.f32 %v919_v15, 0.0 }
 0x24b   :  { %v987_v21 = vmax.f32 %v921_v17, 0.0 }
 0x24c   :  { %v988_v23 = vmax.f32 %v923_v19, 0.0 }
 0x24d   :  { %v1019_v24 = vpack.c.bf16 %v987_v21, %v985_v20 }
 0x24e   :  { %v1020_v25 = vpack.c.bf16 %v988_v23, %v986_v22 }
 0x250   :  { %1065 = vmatprep.subr.bf16.mxu0 %v1020_v25 }
 0x251   :  { %1066 = vmatpush1.bf16.xpose.msra.mxu0 %v1019_v24 }
 0x258   :  { %1068 = vmatmul.mubr.bf16.vlgmr.msra.gmra.mrb[64].mxu0 %v1161_v26 }
 0x32b   :  { %v1069_v44 = vpop.f32.mrb[64].mxu0 }
 0x32c   :  { %v1070_v28 = vadd.f32 %v1069_v44, %v1026_v27  ;;  %v1071_v29 = vpop.f32.mrb[65].mxu0 }
 0x32d   :  { %v1072_v30 = vadd.f32 %v1071_v29, %v1026_v27  ;;  %v1073_v58 = vpop.f32.mrb[66].mxu0 }
 0x32e   :  { %1076 = vst [vmem:[#allocation5] sm:$0xff] %v1070_v28  ;;  %v1074_v31 = vpop.f32.mrb[67].mxu0 }
 0x32f   :  { %1077 = vst [vmem:[#allocation5 + $0x8] sm:$0xff] %v1072_v30 }
 0x330   :  { %1274 = shalt.err (!%p1271_p12)
}
 0x331   :  { %s1275_s13 = scalar_lea.hbm %s1624_s7, 256 }
 0x332   :  { %p1276_p13 = scmp.ne.s32.totalorder %s1624_s7, %s1275_s13  ;;  %p1279_p0 = scmp.lt.u32.totalorder %s1275_s13, %s1624_s7 }
 0x334   :  { %p1281_p1 = pnand %p1279_p0, %p1276_p13 }
 0x336   :  { %1284 = shalt.err (!%p1281_p1)
}
 0x337   :  { %1087 = dma.vmem_to_hbm [thread:$0]  %s1085_s9, 256, %s1624_s7, [#allocation4]  }
 0x338   :  { %1287 = dma.done.wait [#allocation4], 256  }
 0x339   :  { %1288 = vsyncadd [#allocation4], 4294967040 }
 0x33a   :  { %1091 = vsyncpa [#allocation3], 1 }
 0x33b   :  { %1092 = vsyncpa [#allocation4], 1 }

</bundles_post_ra>
